<compile_context>
chip_gen: v7x
topology: tpu7x:2x2x1
jax: 0.10.0
libtpu: 0.0.40
codegen_flags: <defaults>
</compile_context>

<pallas_src>
import functools

import jax
import jax.numpy as jnp
from jax import lax
from jax.experimental import pallas as pl
from jax.experimental.pallas import tpu as pltpu


def _lstm_recurrence_kernel(gx_ref, whh_ref, h_all_ref, h_scr, c_scr, *,
                            hidden_dim, t_chunk, compute_dtype):
    """Sequential LSTM recurrence over one chunk of t_chunk time steps.

    gx_ref    : (t_chunk, B, 4H) f32   precomputed x @ W_ih^T + bias (time-major)
    whh_ref   : (H, 4H) compute_dtype  hidden->gates weights (pre-transposed)
    h_all_ref : (t_chunk, B, H) f32    per-step hidden states (output)
    h_scr     : (B, H) f32 VMEM        hidden state carried across grid chunks
    c_scr     : (B, H) f32 VMEM        cell state carried across grid chunks
    """
    H = hidden_dim

    @pl.when(pl.program_id(0) == 0)
    def _():
        h_scr[...] = jnp.zeros_like(h_scr)
        c_scr[...] = jnp.zeros_like(c_scr)

    whh = whh_ref[...]                 # (H, 4H) — resident across the loop

    # Review item 1: load carried state ONCE per chunk; inside the serial loop
    # h/c live in vregs (loop carry), so each time step has no h/c VMEM
    # round-trip on its critical path.
    carry0 = (h_scr[...], c_scr[...])

    def step(t, carry):
        h_prev, c_prev = carry

        # Only the recurrent matmul remains in the serial loop (MXU, f32 acc).
        gates = gx_ref[t] + jnp.dot(h_prev.astype(compute_dtype), whh,
                                    preferred_element_type=jnp.float32)

        # Review item 2: 3 EUP passes per step instead of 5.  One sigmoid and
        # one tanh over the whole (B, 4H) tile (4H = 128 = one lane row), then
        # slice PyTorch-ordered gates i, f, g, o out of the results.
        sig = jax.nn.sigmoid(gates)
        th = jnp.tanh(gates)
        i_g = sig[:, 0 * H:1 * H]
        f_g = sig[:, 1 * H:2 * H]
        g_g = th[:, 2 * H:3 * H]
        o_g = sig[:, 3 * H:4 * H]

        c_new = f_g * c_prev + i_g * g_g          # f32 state update
        h_new = o_g * jnp.tanh(c_new)

        h_all_ref[t] = h_new                      # only VMEM store per step
        return (h_new, c_new)

    # Cap the unroll (review item 10) so code size / vreg live ranges stay
    # bounded if t_chunk grows; at t_chunk=8 this is a full unroll.
    h_last, c_last = lax.fori_loop(0, t_chunk, step, carry0,
                                   unroll=min(t_chunk, 8))

    # Persist the carried state once per chunk (only needed across chunks).
    h_scr[...] = h_last
    c_scr[...] = c_last


def lstm_model_forward(x, params, *, t_chunk=None, compute_dtype=jnp.float32):
    """x: (B, T, input_dim) batch-first, like PyTorch. Returns (B, T, output_dim)."""
    w_ih, w_hh, b_ih, b_hh, w_fc, b_fc = (
        params["w_ih"], params["w_hh"], params["b_ih"], params["b_hh"],
        params["w_fc"], params["b_fc"])

    B, T, D = x.shape
    H = w_hh.shape[1]
    O = w_fc.shape[0]

    if t_chunk is None:
        # Demo-size T: a single grid step is best.  At scale keep grid > 1 so
        # the next chunk's gates_x DMA overlaps the current chunk's recurrence
        # (review item 4); pick the largest divisor of T that is <= 128.
        t_chunk = T
        if T > 128:
            t_chunk = 128
            while T % t_chunk:
                t_chunk -= 1
    assert T % t_chunk == 0, "t_chunk must divide T"

    # ---- hoisted time-parallel input projection: ONE big matmul (XLA). ----
    # Emits gates_x already time-major (T, B, 4H); no separate transpose of x.
    wih_t = jnp.transpose(w_ih).astype(jnp.float32)            # (D, 4H)
    bias = (b_ih + b_hh).astype(jnp.float32)                   # (4H,)
    gates_x = jnp.einsum("btd,dg->tbg", x.astype(jnp.float32), wih_t) + bias
    # TODO(synk): at scale on v7x, keep gates_x in bf16 (halves HBM traffic and
    # the double-buffered VMEM tenant) and upcast inside the kernel.

    whh_t = jnp.transpose(w_hh).astype(compute_dtype)          # (H, 4H)

    # Explicit VMEM budget (review v7x item): at demo sizes this is the 32 MiB
    # default; at scale size t_chunk so this stays under 64 MiB on v7x.
    itemsize_c = jnp.dtype(compute_dtype).itemsize
    needed = (2 * t_chunk * B * 4 * H * 4      # double-buffered gates_x (f32)
              + 2 * t_chunk * B * H * 4        # double-buffered h_all output
              + 2 * H * 4 * H * itemsize_c     # W_hh^T buffers
              + 2 * B * H * 4)                 # h/c scratch
    vmem_limit = int(min(max(2 * needed, 32 * 1024 * 1024), 64 * 1024 * 1024))

    kernel = functools.partial(_lstm_recurrence_kernel, hidden_dim=H,
                               t_chunk=t_chunk, compute_dtype=compute_dtype)

    h_all = pl.pallas_call(
        kernel,
        out_shape=jax.ShapeDtypeStruct((T, B, H), jnp.float32),
        grid_spec=pltpu.PrefetchScalarGridSpec(
            num_scalar_prefetch=0,
            grid=(T // t_chunk,),                               # = (1,) at demo size
            in_specs=[
                pl.BlockSpec((t_chunk, B, 4 * H), lambda c: (c, 0, 0)),  # gates_x chunk
                pl.BlockSpec((H, 4 * H), lambda c: (0, 0)),              # W_hh^T resident
            ],
            out_specs=pl.BlockSpec((t_chunk, B, H), lambda c: (c, 0, 0)),
            scratch_shapes=[
                pltpu.VMEM((B, H), jnp.float32),   # h state (carried across chunks)
                pltpu.VMEM((B, H), jnp.float32),   # c state
            ],
        ),
        compiler_params=pltpu.CompilerParams(
            dimension_semantics=("arbitrary",),    # time chunks are sequential
            vmem_limit_bytes=vmem_limit),
    )(gates_x, whh_t)

    # ---- hoisted final Linear: ONE big matmul (XLA), emits (B, T, O) directly. ----
    wfc_t = jnp.transpose(w_fc).astype(jnp.float32)             # (H, O)
    y = jnp.einsum("tbh,ho->bto", h_all, wfc_t) + b_fc.astype(jnp.float32)
    return y


def lstm_model_reference(x, params):
    """Pure-JAX reference matching torch semantics (for correctness check)."""
    w_ih, w_hh, b_ih, b_hh, w_fc, b_fc = (
        params["w_ih"], params["w_hh"], params["b_ih"], params["b_hh"],
        params["w_fc"], params["b_fc"])
    B, T, D = x.shape
    H = w_hh.shape[1]

    def step(carry, x_t):
        h, c = carry
        gates = x_t @ w_ih.T + b_ih + h @ w_hh.T + b_hh
        i = jax.nn.sigmoid(gates[:, 0 * H:1 * H])
        f = jax.nn.sigmoid(gates[:, 1 * H:2 * H])
        g = jnp.tanh(gates[:, 2 * H:3 * H])
        o = jax.nn.sigmoid(gates[:, 3 * H:4 * H])
        c = f * c + i * g
        h = o * jnp.tanh(c)
        return (h, c), h

    h0 = jnp.zeros((B, H), jnp.float32)
    c0 = jnp.zeros((B, H), jnp.float32)
    _, hs = lax.scan(step, (h0, c0), jnp.transpose(x, (1, 0, 2)))
    out = jnp.transpose(hs, (1, 0, 2))              # (B, T, H)
    return out @ w_fc.T + b_fc


if __name__ == "__main__":
    # Small shapes consistent with the module's forward: x is (B, T, input_dim).
    B, T, INPUT_DIM, HIDDEN_DIM, OUTPUT_DIM = 2, 8, 16, 32, 8

    key = jax.random.PRNGKey(0)
    kx, k1, k2, k3, k4, k5, k6 = jax.random.split(key, 7)

    x = jax.random.normal(kx, (B, T, INPUT_DIM), dtype=jnp.float32)

    # Deterministic parameter init mirroring PyTorch shapes (U(-1/sqrt(H), 1/sqrt(H))).
    s = 1.0 / jnp.sqrt(jnp.float32(HIDDEN_DIM))
    params = {
        "w_ih": jax.random.uniform(k1, (4 * HIDDEN_DIM, INPUT_DIM), jnp.float32, -s, s),
        "w_hh": jax.random.uniform(k2, (4 * HIDDEN_DIM, HIDDEN_DIM), jnp.float32, -s, s),
        "b_ih": jax.random.uniform(k3, (4 * HIDDEN_DIM,), jnp.float32, -s, s),
        "b_hh": jax.random.uniform(k4, (4 * HIDDEN_DIM,), jnp.float32, -s, s),
        "w_fc": jax.random.uniform(k5, (OUTPUT_DIM, HIDDEN_DIM), jnp.float32, -s, s),
        "b_fc": jax.random.uniform(k6, (OUTPUT_DIM,), jnp.float32, -s, s),
    }

    # f32 path: must match the pure-JAX/torch-semantics reference tightly.
    y = jax.block_until_ready(lstm_model_forward(x, params))
    y_ref = lstm_model_reference(x, params)
    assert y.shape == (B, T, OUTPUT_DIM)
    assert jnp.allclose(y, y_ref, atol=1e-5, rtol=1e-5), "f32 mismatch vs reference"

    # bf16 recurrent-matmul path: only the MXU operands are rounded to bf16
    # (state update and gate math stay f32), so require a modest max abs error.
    y_bf16 = jax.block_until_ready(
        lstm_model_forward(x, params, compute_dtype=jnp.bfloat16))
    max_err = float(jnp.max(jnp.abs(y_bf16 - y_ref)))
    assert max_err < 3e-2, f"bf16 mismatch vs reference (max abs err {max_err})"

    print("KERNEL_OK")
</pallas_src>

<mosaic_0001>
module attributes {stable_mosaic.version = 11 : i64} {
  func.func @_lstm_recurrence_kernel(%arg0: i32, %arg1: memref<8x2x128xf32, #tpu.memory_space<vmem>>, %arg2: memref<32x128xf32, #tpu.memory_space<vmem>>, %arg3: memref<8x2x32xf32, #tpu.memory_space<vmem>>, %arg4: memref<2x32xf32, #tpu.memory_space<vmem>>, %arg5: memref<2x32xf32, #tpu.memory_space<vmem>>) attributes {dimension_semantics = [#tpu.dimension_semantics<arbitrary>], iteration_bounds = array<i64: 1>, scalar_prefetch = 0 : i64, scratch_operands = 2 : i64, tpu.core_type = #tpu.core_type<tc>, window_params = [{transform_indices = @transform_0, window_bounds = array<i64: 8, 2, 128>}, {pipeline_mode = #tpu.pipeline_mode<synchronous>, transform_indices = @transform_1, window_bounds = array<i64: 32, 128>}, {transform_indices = @transform_2, window_bounds = array<i64: 8, 2, 32>}]} {
    %c0_i32 = arith.constant 0 : i32
    %0 = arith.cmpi eq, %arg0, %c0_i32 : i32
    %1 = arith.extui %0 : i1 to i32
    %c0_i32_0 = arith.constant 0 : i32
    %2 = arith.cmpi ne, %1, %c0_i32_0 : i32
    scf.if %2 {
      %cst_58 = arith.constant 0.000000e+00 : f32
      %200 = vector.broadcast %cst_58 : f32 to vector<2x32xf32>
      %c0_59 = arith.constant 0 : index
      %c0_60 = arith.constant 0 : index
      %201 = vector.load %arg4[%c0_59, %c0_60] : memref<2x32xf32, #tpu.memory_space<vmem>>, vector<2x32xf32>
      tpu.vector_store %arg4[%c0_59, %c0_60], %200 {strides = array<i32>} : memref<2x32xf32, #tpu.memory_space<vmem>>, vector<2x32xf32>,
      %cst_61 = arith.constant 0.000000e+00 : f32
      %202 = vector.broadcast %cst_61 : f32 to vector<2x32xf32>
      %c0_62 = arith.constant 0 : index
      %c0_63 = arith.constant 0 : index
      %203 = vector.load %arg5[%c0_62, %c0_63] : memref<2x32xf32, #tpu.memory_space<vmem>>, vector<2x32xf32>
      tpu.vector_store %arg5[%c0_62, %c0_63], %202 {strides = array<i32>} : memref<2x32xf32, #tpu.memory_space<vmem>>, vector<2x32xf32>,
    } else {
    }
    %c0 = arith.constant 0 : index
    %c0_1 = arith.constant 0 : index
    %3 = vector.load %arg2[%c0, %c0_1] : memref<32x128xf32, #tpu.memory_space<vmem>>, vector<32x128xf32>
    %c0_2 = arith.constant 0 : index
    %c0_3 = arith.constant 0 : index
    %4 = vector.load %arg4[%c0_2, %c0_3] : memref<2x32xf32, #tpu.memory_space<vmem>>, vector<2x32xf32>
    %c0_4 = arith.constant 0 : index
    %c0_5 = arith.constant 0 : index
    %5 = vector.load %arg5[%c0_4, %c0_5] : memref<2x32xf32, #tpu.memory_space<vmem>>, vector<2x32xf32>
    %c0_i32_6 = arith.constant 0 : i32
    %6 = arith.index_cast %c0_i32_6 : i32 to index
    %c0_7 = arith.constant 0 : index
    %c0_8 = arith.constant 0 : index
    %7 = vector.load %arg1[%6, %c0_7, %c0_8] : memref<8x2x128xf32, #tpu.memory_space<vmem>>, vector<1x2x128xf32>
    %8 = vector.shape_cast %7 : vector<1x2x128xf32> to vector<2x128xf32>
    %cst = arith.constant dense<0.000000e+00> : vector<2x128xf32>
    %9 = tpu.matmul %4, %3, %cst {dimension_numbers = #tpu.dot_dimension_numbers<[1], [0], [0], [1], [0, 0, 1, 1], [], []>} : vector<2x32xf32>, vector<32x128xf32>, vector<2x128xf32> -> vector<2x128xf32>
    %10 = arith.addf %8, %9 : vector<2x128xf32>
    %11 = arith.negf %10 : vector<2x128xf32>
    %12 = math.exp %11 : vector<2x128xf32>
    %cst_9 = arith.constant 1.000000e+00 : f32
    %13 = vector.broadcast %cst_9 : f32 to vector<2x128xf32>
    %14 = arith.addf %13, %12 : vector<2x128xf32>
    %15 = arith.divf %13, %14 : vector<2x128xf32>
    %16 = math.tanh %10 : vector<2x128xf32>
    %17 = vector.extract_strided_slice %15 {offsets = [0, 0], sizes = [2, 32], strides = [1, 1]} : vector<2x128xf32> to vector<2x32xf32>
    %18 = vector.extract_strided_slice %15 {offsets = [0, 32], sizes = [2, 32], strides = [1, 1]} : vector<2x128xf32> to vector<2x32xf32>
    %19 = vector.extract_strided_slice %16 {offsets = [0, 64], sizes = [2, 32], strides = [1, 1]} : vector<2x128xf32> to vector<2x32xf32>
    %20 = vector.extract_strided_slice %15 {offsets = [0, 96], sizes = [2, 32], strides = [1, 1]} : vector<2x128xf32> to vector<2x32xf32>
    %21 = arith.mulf %18, %5 : vector<2x32xf32>
    %22 = arith.mulf %17, %19 : vector<2x32xf32>
    %23 = arith.addf %21, %22 : vector<2x32xf32>
    %24 = math.tanh %23 : vector<2x32xf32>
    %25 = arith.mulf %20, %24 : vector<2x32xf32>
    %26 = arith.index_cast %c0_i32_6 : i32 to index
    %c0_10 = arith.constant 0 : index
    %c0_11 = arith.constant 0 : index
    %27 = vector.load %arg3[%26, %c0_10, %c0_11] : memref<8x2x32xf32, #tpu.memory_space<vmem>>, vector<1x2x32xf32>
    %28 = vector.shape_cast %27 : vector<1x2x32xf32> to vector<2x32xf32>
    %29 = vector.shape_cast %25 : vector<2x32xf32> to vector<1x2x32xf32>
    tpu.vector_store %arg3[%26, %c0_10, %c0_11], %29 {strides = array<i32>} : memref<8x2x32xf32, #tpu.memory_space<vmem>>, vector<1x2x32xf32>,
    %c1_i32 = arith.constant 1 : i32
    %30 = arith.index_cast %c1_i32 : i32 to index
    %c0_12 = arith.constant 0 : index
    %c0_13 = arith.constant 0 : index
    %31 = vector.load %arg1[%30, %c0_12, %c0_13] : memref<8x2x128xf32, #tpu.memory_space<vmem>>, vector<1x2x128xf32>
    %32 = vector.shape_cast %31 : vector<1x2x128xf32> to vector<2x128xf32>
    %cst_14 = arith.constant dense<0.000000e+00> : vector<2x128xf32>
    %33 = tpu.matmul %25, %3, %cst_14 {dimension_numbers = #tpu.dot_dimension_numbers<[1], [0], [0], [1], [0, 0, 1, 1], [], []>} : vector<2x32xf32>, vector<32x128xf32>, vector<2x128xf32> -> vector<2x128xf32>
    %34 = arith.addf %32, %33 : vector<2x128xf32>
    %35 = arith.negf %34 : vector<2x128xf32>
    %36 = math.exp %35 : vector<2x128xf32>
    %cst_15 = arith.constant 1.000000e+00 : f32
    %37 = vector.broadcast %cst_15 : f32 to vector<2x128xf32>
    %38 = arith.addf %37, %36 : vector<2x128xf32>
    %39 = arith.divf %37, %38 : vector<2x128xf32>
    %40 = math.tanh %34 : vector<2x128xf32>
    %41 = vector.extract_strided_slice %39 {offsets = [0, 0], sizes = [2, 32], strides = [1, 1]} : vector<2x128xf32> to vector<2x32xf32>
    %42 = vector.extract_strided_slice %39 {offsets = [0, 32], sizes = [2, 32], strides = [1, 1]} : vector<2x128xf32> to vector<2x32xf32>
    %43 = vector.extract_strided_slice %40 {offsets = [0, 64], sizes = [2, 32], strides = [1, 1]} : vector<2x128xf32> to vector<2x32xf32>
    %44 = vector.extract_strided_slice %39 {offsets = [0, 96], sizes = [2, 32], strides = [1, 1]} : vector<2x128xf32> to vector<2x32xf32>
    %45 = arith.mulf %42, %23 : vector<2x32xf32>
    %46 = arith.mulf %41, %43 : vector<2x32xf32>
    %47 = arith.addf %45, %46 : vector<2x32xf32>
    %48 = math.tanh %47 : vector<2x32xf32>
    %49 = arith.mulf %44, %48 : vector<2x32xf32>
    %50 = arith.index_cast %c1_i32 : i32 to index
    %c0_16 = arith.constant 0 : index
    %c0_17 = arith.constant 0 : index
    %51 = vector.load %arg3[%50, %c0_16, %c0_17] : memref<8x2x32xf32, #tpu.memory_space<vmem>>, vector<1x2x32xf32>
    %52 = vector.shape_cast %51 : vector<1x2x32xf32> to vector<2x32xf32>
    %53 = vector.shape_cast %49 : vector<2x32xf32> to vector<1x2x32xf32>
    tpu.vector_store %arg3[%50, %c0_16, %c0_17], %53 {strides = array<i32>} : memref<8x2x32xf32, #tpu.memory_space<vmem>>, vector<1x2x32xf32>,
    %c2_i32 = arith.constant 2 : i32
    %54 = arith.index_cast %c2_i32 : i32 to index
    %c0_18 = arith.constant 0 : index
    %c0_19 = arith.constant 0 : index
    %55 = vector.load %arg1[%54, %c0_18, %c0_19] : memref<8x2x128xf32, #tpu.memory_space<vmem>>, vector<1x2x128xf32>
    %56 = vector.shape_cast %55 : vector<1x2x128xf32> to vector<2x128xf32>
    %cst_20 = arith.constant dense<0.000000e+00> : vector<2x128xf32>
    %57 = tpu.matmul %49, %3, %cst_20 {dimension_numbers = #tpu.dot_dimension_numbers<[1], [0], [0], [1], [0, 0, 1, 1], [], []>} : vector<2x32xf32>, vector<32x128xf32>, vector<2x128xf32> -> vector<2x128xf32>
    %58 = arith.addf %56, %57 : vector<2x128xf32>
    %59 = arith.negf %58 : vector<2x128xf32>
    %60 = math.exp %59 : vector<2x128xf32>
    %cst_21 = arith.constant 1.000000e+00 : f32
    %61 = vector.broadcast %cst_21 : f32 to vector<2x128xf32>
    %62 = arith.addf %61, %60 : vector<2x128xf32>
    %63 = arith.divf %61, %62 : vector<2x128xf32>
    %64 = math.tanh %58 : vector<2x128xf32>
    %65 = vector.extract_strided_slice %63 {offsets = [0, 0], sizes = [2, 32], strides = [1, 1]} : vector<2x128xf32> to vector<2x32xf32>
    %66 = vector.extract_strided_slice %63 {offsets = [0, 32], sizes = [2, 32], strides = [1, 1]} : vector<2x128xf32> to vector<2x32xf32>
    %67 = vector.extract_strided_slice %64 {offsets = [0, 64], sizes = [2, 32], strides = [1, 1]} : vector<2x128xf32> to vector<2x32xf32>
    %68 = vector.extract_strided_slice %63 {offsets = [0, 96], sizes = [2, 32], strides = [1, 1]} : vector<2x128xf32> to vector<2x32xf32>
    %69 = arith.mulf %66, %47 : vector<2x32xf32>
    %70 = arith.mulf %65, %67 : vector<2x32xf32>
    %71 = arith.addf %69, %70 : vector<2x32xf32>
    %72 = math.tanh %71 : vector<2x32xf32>
    %73 = arith.mulf %68, %72 : vector<2x32xf32>
    %74 = arith.index_cast %c2_i32 : i32 to index
    %c0_22 = arith.constant 0 : index
    %c0_23 = arith.constant 0 : index
    %75 = vector.load %arg3[%74, %c0_22, %c0_23] : memref<8x2x32xf32, #tpu.memory_space<vmem>>, vector<1x2x32xf32>
    %76 = vector.shape_cast %75 : vector<1x2x32xf32> to vector<2x32xf32>
    %77 = vector.shape_cast %73 : vector<2x32xf32> to vector<1x2x32xf32>
    tpu.vector_store %arg3[%74, %c0_22, %c0_23], %77 {strides = array<i32>} : memref<8x2x32xf32, #tpu.memory_space<vmem>>, vector<1x2x32xf32>,
    %c3_i32 = arith.constant 3 : i32
    %78 = arith.index_cast %c3_i32 : i32 to index
    %c0_24 = arith.constant 0 : index
    %c0_25 = arith.constant 0 : index
    %79 = vector.load %arg1[%78, %c0_24, %c0_25] : memref<8x2x128xf32, #tpu.memory_space<vmem>>, vector<1x2x128xf32>
    %80 = vector.shape_cast %79 : vector<1x2x128xf32> to vector<2x128xf32>
    %cst_26 = arith.constant dense<0.000000e+00> : vector<2x128xf32>
    %81 = tpu.matmul %73, %3, %cst_26 {dimension_numbers = #tpu.dot_dimension_numbers<[1], [0], [0], [1], [0, 0, 1, 1], [], []>} : vector<2x32xf32>, vector<32x128xf32>, vector<2x128xf32> -> vector<2x128xf32>
    %82 = arith.addf %80, %81 : vector<2x128xf32>
    %83 = arith.negf %82 : vector<2x128xf32>
    %84 = math.exp %83 : vector<2x128xf32>
    %cst_27 = arith.constant 1.000000e+00 : f32
    %85 = vector.broadcast %cst_27 : f32 to vector<2x128xf32>
    %86 = arith.addf %85, %84 : vector<2x128xf32>
    %87 = arith.divf %85, %86 : vector<2x128xf32>
    %88 = math.tanh %82 : vector<2x128xf32>
    %89 = vector.extract_strided_slice %87 {offsets = [0, 0], sizes = [2, 32], strides = [1, 1]} : vector<2x128xf32> to vector<2x32xf32>
    %90 = vector.extract_strided_slice %87 {offsets = [0, 32], sizes = [2, 32], strides = [1, 1]} : vector<2x128xf32> to vector<2x32xf32>
    %91 = vector.extract_strided_slice %88 {offsets = [0, 64], sizes = [2, 32], strides = [1, 1]} : vector<2x128xf32> to vector<2x32xf32>
    %92 = vector.extract_strided_slice %87 {offsets = [0, 96], sizes = [2, 32], strides = [1, 1]} : vector<2x128xf32> to vector<2x32xf32>
    %93 = arith.mulf %90, %71 : vector<2x32xf32>
    %94 = arith.mulf %89, %91 : vector<2x32xf32>
    %95 = arith.addf %93, %94 : vector<2x32xf32>
    %96 = math.tanh %95 : vector<2x32xf32>
    %97 = arith.mulf %92, %96 : vector<2x32xf32>
    %98 = arith.index_cast %c3_i32 : i32 to index
    %c0_28 = arith.constant 0 : index
    %c0_29 = arith.constant 0 : index
    %99 = vector.load %arg3[%98, %c0_28, %c0_29] : memref<8x2x32xf32, #tpu.memory_space<vmem>>, vector<1x2x32xf32>
    %100 = vector.shape_cast %99 : vector<1x2x32xf32> to vector<2x32xf32>
    %101 = vector.shape_cast %97 : vector<2x32xf32> to vector<1x2x32xf32>
    tpu.vector_store %arg3[%98, %c0_28, %c0_29], %101 {strides = array<i32>} : memref<8x2x32xf32, #tpu.memory_space<vmem>>, vector<1x2x32xf32>,
    %c4_i32 = arith.constant 4 : i32
    %102 = arith.index_cast %c4_i32 : i32 to index
    %c0_30 = arith.constant 0 : index
    %c0_31 = arith.constant 0 : index
    %103 = vector.load %arg1[%102, %c0_30, %c0_31] : memref<8x2x128xf32, #tpu.memory_space<vmem>>, vector<1x2x128xf32>
    %104 = vector.shape_cast %103 : vector<1x2x128xf32> to vector<2x128xf32>
    %cst_32 = arith.constant dense<0.000000e+00> : vector<2x128xf32>
    %105 = tpu.matmul %97, %3, %cst_32 {dimension_numbers = #tpu.dot_dimension_numbers<[1], [0], [0], [1], [0, 0, 1, 1], [], []>} : vector<2x32xf32>, vector<32x128xf32>, vector<2x128xf32> -> vector<2x128xf32>
    %106 = arith.addf %104, %105 : vector<2x128xf32>
    %107 = arith.negf %106 : vector<2x128xf32>
    %108 = math.exp %107 : vector<2x128xf32>
    %cst_33 = arith.constant 1.000000e+00 : f32
    %109 = vector.broadcast %cst_33 : f32 to vector<2x128xf32>
    %110 = arith.addf %109, %108 : vector<2x128xf32>
    %111 = arith.divf %109, %110 : vector<2x128xf32>
    %112 = math.tanh %106 : vector<2x128xf32>
    %113 = vector.extract_strided_slice %111 {offsets = [0, 0], sizes = [2, 32], strides = [1, 1]} : vector<2x128xf32> to vector<2x32xf32>
    %114 = vector.extract_strided_slice %111 {offsets = [0, 32], sizes = [2, 32], strides = [1, 1]} : vector<2x128xf32> to vector<2x32xf32>
    %115 = vector.extract_strided_slice %112 {offsets = [0, 64], sizes = [2, 32], strides = [1, 1]} : vector<2x128xf32> to vector<2x32xf32>
    %116 = vector.extract_strided_slice %111 {offsets = [0, 96], sizes = [2, 32], strides = [1, 1]} : vector<2x128xf32> to vector<2x32xf32>
    %117 = arith.mulf %114, %95 : vector<2x32xf32>
    %118 = arith.mulf %113, %115 : vector<2x32xf32>
    %119 = arith.addf %117, %118 : vector<2x32xf32>
    %120 = math.tanh %119 : vector<2x32xf32>
    %121 = arith.mulf %116, %120 : vector<2x32xf32>
    %122 = arith.index_cast %c4_i32 : i32 to index
    %c0_34 = arith.constant 0 : index
    %c0_35 = arith.constant 0 : index
    %123 = vector.load %arg3[%122, %c0_34, %c0_35] : memref<8x2x32xf32, #tpu.memory_space<vmem>>, vector<1x2x32xf32>
    %124 = vector.shape_cast %123 : vector<1x2x32xf32> to vector<2x32xf32>
    %125 = vector.shape_cast %121 : vector<2x32xf32> to vector<1x2x32xf32>
    tpu.vector_store %arg3[%122, %c0_34, %c0_35], %125 {strides = array<i32>} : memref<8x2x32xf32, #tpu.memory_space<vmem>>, vector<1x2x32xf32>,
    %c5_i32 = arith.constant 5 : i32
    %126 = arith.index_cast %c5_i32 : i32 to index
    %c0_36 = arith.constant 0 : index
    %c0_37 = arith.constant 0 : index
    %127 = vector.load %arg1[%126, %c0_36, %c0_37] : memref<8x2x128xf32, #tpu.memory_space<vmem>>, vector<1x2x128xf32>
    %128 = vector.shape_cast %127 : vector<1x2x128xf32> to vector<2x128xf32>
    %cst_38 = arith.constant dense<0.000000e+00> : vector<2x128xf32>
    %129 = tpu.matmul %121, %3, %cst_38 {dimension_numbers = #tpu.dot_dimension_numbers<[1], [0], [0], [1], [0, 0, 1, 1], [], []>} : vector<2x32xf32>, vector<32x128xf32>, vector<2x128xf32> -> vector<2x128xf32>
    %130 = arith.addf %128, %129 : vector<2x128xf32>
    %131 = arith.negf %130 : vector<2x128xf32>
    %132 = math.exp %131 : vector<2x128xf32>
    %cst_39 = arith.constant 1.000000e+00 : f32
    %133 = vector.broadcast %cst_39 : f32 to vector<2x128xf32>
    %134 = arith.addf %133, %132 : vector<2x128xf32>
    %135 = arith.divf %133, %134 : vector<2x128xf32>
    %136 = math.tanh %130 : vector<2x128xf32>
    %137 = vector.extract_strided_slice %135 {offsets = [0, 0], sizes = [2, 32], strides = [1, 1]} : vector<2x128xf32> to vector<2x32xf32>
    %138 = vector.extract_strided_slice %135 {offsets = [0, 32], sizes = [2, 32], strides = [1, 1]} : vector<2x128xf32> to vector<2x32xf32>
    %139 = vector.extract_strided_slice %136 {offsets = [0, 64], sizes = [2, 32], strides = [1, 1]} : vector<2x128xf32> to vector<2x32xf32>
    %140 = vector.extract_strided_slice %135 {offsets = [0, 96], sizes = [2, 32], strides = [1, 1]} : vector<2x128xf32> to vector<2x32xf32>
    %141 = arith.mulf %138, %119 : vector<2x32xf32>
    %142 = arith.mulf %137, %139 : vector<2x32xf32>
    %143 = arith.addf %141, %142 : vector<2x32xf32>
    %144 = math.tanh %143 : vector<2x32xf32>
    %145 = arith.mulf %140, %144 : vector<2x32xf32>
    %146 = arith.index_cast %c5_i32 : i32 to index
    %c0_40 = arith.constant 0 : index
    %c0_41 = arith.constant 0 : index
    %147 = vector.load %arg3[%146, %c0_40, %c0_41] : memref<8x2x32xf32, #tpu.memory_space<vmem>>, vector<1x2x32xf32>
    %148 = vector.shape_cast %147 : vector<1x2x32xf32> to vector<2x32xf32>
    %149 = vector.shape_cast %145 : vector<2x32xf32> to vector<1x2x32xf32>
    tpu.vector_store %arg3[%146, %c0_40, %c0_41], %149 {strides = array<i32>} : memref<8x2x32xf32, #tpu.memory_space<vmem>>, vector<1x2x32xf32>,
    %c6_i32 = arith.constant 6 : i32
    %150 = arith.index_cast %c6_i32 : i32 to index
    %c0_42 = arith.constant 0 : index
    %c0_43 = arith.constant 0 : index
    %151 = vector.load %arg1[%150, %c0_42, %c0_43] : memref<8x2x128xf32, #tpu.memory_space<vmem>>, vector<1x2x128xf32>
    %152 = vector.shape_cast %151 : vector<1x2x128xf32> to vector<2x128xf32>
    %cst_44 = arith.constant dense<0.000000e+00> : vector<2x128xf32>
    %153 = tpu.matmul %145, %3, %cst_44 {dimension_numbers = #tpu.dot_dimension_numbers<[1], [0], [0], [1], [0, 0, 1, 1], [], []>} : vector<2x32xf32>, vector<32x128xf32>, vector<2x128xf32> -> vector<2x128xf32>
    %154 = arith.addf %152, %153 : vector<2x128xf32>
    %155 = arith.negf %154 : vector<2x128xf32>
    %156 = math.exp %155 : vector<2x128xf32>
    %cst_45 = arith.constant 1.000000e+00 : f32
    %157 = vector.broadcast %cst_45 : f32 to vector<2x128xf32>
    %158 = arith.addf %157, %156 : vector<2x128xf32>
    %159 = arith.divf %157, %158 : vector<2x128xf32>
    %160 = math.tanh %154 : vector<2x128xf32>
    %161 = vector.extract_strided_slice %159 {offsets = [0, 0], sizes = [2, 32], strides = [1, 1]} : vector<2x128xf32> to vector<2x32xf32>
    %162 = vector.extract_strided_slice %159 {offsets = [0, 32], sizes = [2, 32], strides = [1, 1]} : vector<2x128xf32> to vector<2x32xf32>
    %163 = vector.extract_strided_slice %160 {offsets = [0, 64], sizes = [2, 32], strides = [1, 1]} : vector<2x128xf32> to vector<2x32xf32>
    %164 = vector.extract_strided_slice %159 {offsets = [0, 96], sizes = [2, 32], strides = [1, 1]} : vector<2x128xf32> to vector<2x32xf32>
    %165 = arith.mulf %162, %143 : vector<2x32xf32>
    %166 = arith.mulf %161, %163 : vector<2x32xf32>
    %167 = arith.addf %165, %166 : vector<2x32xf32>
    %168 = math.tanh %167 : vector<2x32xf32>
    %169 = arith.mulf %164, %168 : vector<2x32xf32>
    %170 = arith.index_cast %c6_i32 : i32 to index
    %c0_46 = arith.constant 0 : index
    %c0_47 = arith.constant 0 : index
    %171 = vector.load %arg3[%170, %c0_46, %c0_47] : memref<8x2x32xf32, #tpu.memory_space<vmem>>, vector<1x2x32xf32>
    %172 = vector.shape_cast %171 : vector<1x2x32xf32> to vector<2x32xf32>
    %173 = vector.shape_cast %169 : vector<2x32xf32> to vector<1x2x32xf32>
    tpu.vector_store %arg3[%170, %c0_46, %c0_47], %173 {strides = array<i32>} : memref<8x2x32xf32, #tpu.memory_space<vmem>>, vector<1x2x32xf32>,
    %c7_i32 = arith.constant 7 : i32
    %174 = arith.index_cast %c7_i32 : i32 to index
    %c0_48 = arith.constant 0 : index
    %c0_49 = arith.constant 0 : index
    %175 = vector.load %arg1[%174, %c0_48, %c0_49] : memref<8x2x128xf32, #tpu.memory_space<vmem>>, vector<1x2x128xf32>
    %176 = vector.shape_cast %175 : vector<1x2x128xf32> to vector<2x128xf32>
    %cst_50 = arith.constant dense<0.000000e+00> : vector<2x128xf32>
    %177 = tpu.matmul %169, %3, %cst_50 {dimension_numbers = #tpu.dot_dimension_numbers<[1], [0], [0], [1], [0, 0, 1, 1], [], []>} : vector<2x32xf32>, vector<32x128xf32>, vector<2x128xf32> -> vector<2x128xf32>
    %178 = arith.addf %176, %177 : vector<2x128xf32>
    %179 = arith.negf %178 : vector<2x128xf32>
    %180 = math.exp %179 : vector<2x128xf32>
    %cst_51 = arith.constant 1.000000e+00 : f32
    %181 = vector.broadcast %cst_51 : f32 to vector<2x128xf32>
    %182 = arith.addf %181, %180 : vector<2x128xf32>
    %183 = arith.divf %181, %182 : vector<2x128xf32>
    %184 = math.tanh %178 : vector<2x128xf32>
    %185 = vector.extract_strided_slice %183 {offsets = [0, 0], sizes = [2, 32], strides = [1, 1]} : vector<2x128xf32> to vector<2x32xf32>
    %186 = vector.extract_strided_slice %183 {offsets = [0, 32], sizes = [2, 32], strides = [1, 1]} : vector<2x128xf32> to vector<2x32xf32>
    %187 = vector.extract_strided_slice %184 {offsets = [0, 64], sizes = [2, 32], strides = [1, 1]} : vector<2x128xf32> to vector<2x32xf32>
    %188 = vector.extract_strided_slice %183 {offsets = [0, 96], sizes = [2, 32], strides = [1, 1]} : vector<2x128xf32> to vector<2x32xf32>
    %189 = arith.mulf %186, %167 : vector<2x32xf32>
    %190 = arith.mulf %185, %187 : vector<2x32xf32>
    %191 = arith.addf %189, %190 : vector<2x32xf32>
    %192 = math.tanh %191 : vector<2x32xf32>
    %193 = arith.mulf %188, %192 : vector<2x32xf32>
    %194 = arith.index_cast %c7_i32 : i32 to index
    %c0_52 = arith.constant 0 : index
    %c0_53 = arith.constant 0 : index
    %195 = vector.load %arg3[%194, %c0_52, %c0_53] : memref<8x2x32xf32, #tpu.memory_space<vmem>>, vector<1x2x32xf32>
    %196 = vector.shape_cast %195 : vector<1x2x32xf32> to vector<2x32xf32>
    %197 = vector.shape_cast %193 : vector<2x32xf32> to vector<1x2x32xf32>
    tpu.vector_store %arg3[%194, %c0_52, %c0_53], %197 {strides = array<i32>} : memref<8x2x32xf32, #tpu.memory_space<vmem>>, vector<1x2x32xf32>,
    %c8_i32 = arith.constant 8 : i32
    %c0_54 = arith.constant 0 : index
    %c0_55 = arith.constant 0 : index
    %198 = vector.load %arg4[%c0_54, %c0_55] : memref<2x32xf32, #tpu.memory_space<vmem>>, vector<2x32xf32>
    tpu.vector_store %arg4[%c0_54, %c0_55], %193 {strides = array<i32>} : memref<2x32xf32, #tpu.memory_space<vmem>>, vector<2x32xf32>,
    %c0_56 = arith.constant 0 : index
    %c0_57 = arith.constant 0 : index
    %199 = vector.load %arg5[%c0_56, %c0_57] : memref<2x32xf32, #tpu.memory_space<vmem>>, vector<2x32xf32>
    tpu.vector_store %arg5[%c0_56, %c0_57], %191 {strides = array<i32>} : memref<2x32xf32, #tpu.memory_space<vmem>>, vector<2x32xf32>,
    return
  }
  func.func @transform_0(%arg0: i32) -> (i32, i32, i32) {
    %c0_i32 = arith.constant 0 : i32
    %c0_i32_0 = arith.constant 0 : i32
    %c0_i32_1 = arith.constant 0 : i32
    return %arg0, %c0_i32, %c0_i32_0 : i32, i32, i32
  }
  func.func @transform_1(%arg0: i32) -> (i32, i32) {
    %c0_i32 = arith.constant 0 : i32
    %c0_i32_0 = arith.constant 0 : i32
    %c0_i32_1 = arith.constant 0 : i32
    return %c0_i32, %c0_i32_0 : i32, i32
  }
  func.func @transform_2(%arg0: i32) -> (i32, i32, i32) {
    %c0_i32 = arith.constant 0 : i32
    %c0_i32_0 = arith.constant 0 : i32
    %c0_i32_1 = arith.constant 0 : i32
    return %arg0, %c0_i32, %c0_i32_0 : i32, i32, i32
  }
}

</mosaic_0001>

<bundles_post_ra>
// kernel: tpu_custom_call.1
= control target key start
LH: loop header
LB: loop body
LE: loop exit
PB: predicated region body
PF: predicated region fallthrough
CT: control target
= control target key end

     0   :  { %7 = vsyncpa [#allocation5], 0  ;;  %s1438_s0 = inlined_call_operand.hbm [shape: f32[8,2,128], index: 0, kind: input, shape index: {}]   ;;  %s1439_s1 = inlined_call_operand.hbm [shape: f32[32,128], index: 1, kind: input, shape index: {}]   ;;  %s1440_s2 = inlined_call_operand.hbm [shape: f32[8,2,32], index: 2, kind: output, shape index: {}]  }
   0x1   :  { %8 = vsyncpa [#allocation8], 0 }
   0x2   :  { %9 = vsyncpa [#allocation6], 0  ;;  %s1262_s9 = smov [#allocation4]   ;;  %s1190_s13 = scalar_lea.hbm %s1438_s0, 256 }
   0x3   :  { %s15_s10 = sshll.u32 %s1262_s9, 4  ;;  %p1191_p0 = scmp.ne.s32.totalorder %s1438_s0, %s1190_s13  ;;  %s16_s10 = int_to_ptr.vmem [resolvable:$true] %s15_s10 }
   0x4   :  { %p1194_p1 = scmp.lt.u32.totalorder %s1190_s13, %s1438_s0 }
   0x6   :  { %p1196_p2 = pnand %p1194_p1, %p1191_p0 }
   0x8   :  { %1199 = shalt.err (!%p1196_p2)
}
   0x9   :  { %s1200_s18 = scalar_lea.vmem %s16_s10, 256  ;;  %p1205_p4 = scmp.lt.s32.totalorder %s16_s10, %s16_s10 }
   0xa   :  { %p1201_p3 = scmp.ne.s32.totalorder %s16_s10, %s1200_s18  ;;  %p1206_p5 = scmp.lt.s32.totalorder %s1200_s18, %s1200_s18 }
   0xc   :  { %p1207_p6 = por %p1206_p5, %p1205_p4 }
   0xe   :  { %p1208_p7 = pnand %p1207_p6, %p1201_p3 }
  0x10   :  { %1211 = shalt.err (!%p1208_p7)
}
  0x11   :  { %s1263_s19 = smov 32   ;;  %s1264_s20 = smov 2  }
  0x12   :  { %21 = dma.hbm_to_vmem [thread:$0]  %s1438_s0, 256, %s16_s10, [#allocation5], %s1263_s19, %s1263_s19, %s1264_s20  }
  0x13   :  { %s1265_s23 = smov [#allocation7]   ;;  %s1212_s27 = scalar_lea.hbm %s1439_s1, 512 }
  0x14   :  { %s27_s24 = sshll.u32 %s1265_s23, 4  ;;  %p1213_p8 = scmp.ne.s32.totalorder %s1439_s1, %s1212_s27  ;;  %s28_s24 = int_to_ptr.vmem [resolvable:$true] %s27_s24 }
  0x15   :  { %p1216_p9 = scmp.lt.u32.totalorder %s1212_s27, %s1439_s1 }
  0x17   :  { %p1218_p10 = pnand %p1216_p9, %p1213_p8 }
  0x19   :  { %1221 = shalt.err (!%p1218_p10)
}
  0x1a   :  { %s1222_s4 = scalar_lea.vmem %s28_s24, 512  ;;  %p1227_p12 = scmp.lt.s32.totalorder %s28_s24, %s28_s24 }
  0x1b   :  { %p1223_p11 = scmp.ne.s32.totalorder %s28_s24, %s1222_s4  ;;  %p1228_p13 = scmp.lt.s32.totalorder %s1222_s4, %s1222_s4 }
  0x1d   :  { %p1229_p0 = por %p1228_p13, %p1227_p12 }
  0x1f   :  { %p1230_p1 = pnand %p1229_p0, %p1223_p11 }
  0x21   :  { %1233 = shalt.err (!%p1230_p1)
}
  0x22   :  { %s1266_s0 = smov 128   ;;  %s1267_s5 = smov 8  }
  0x23   :  { %33 = dma.hbm_to_vmem [thread:$0]  %s1439_s1, 512, %s28_s24, [#allocation8], %s1266_s0, %s1266_s0, %s1267_s5  }
  0x24   :  { %1256 = dma.done.wait [#allocation5], 256  }
  0x25   :  { %1257 = vsyncadd [#allocation5], 4294967040 }
  0x26   :  { %1258 = dma.done.wait [#allocation8], 512  }
  0x27   :  { %1259 = vsyncadd [#allocation8], 4294966784  ;;  %vm44_vm0 = vcmask 254976   ;;  %v1268_v0 = vmov 0.0|0.0   ;;  %vm1269_vm1 = vmmov 0   ;;  %v1270_v1 = vmov 0.0  }
  0x28   :  { %1066 = vmatprep.subr.bf16.mxu0 %v1268_v0  ;;  %986 = vmatprep.mubr.msk.f32.mxu0 %vm1269_vm1, %v1270_v1  ;;  %45 = vst.msk [vmem:[#allocation2] sm:$0x3] %vm44_vm0, %v1270_v1  ;;  %46 = vst.msk [vmem:[#allocation3] sm:$0x3] %vm44_vm0, %v1270_v1  ;;  %v47_v2 = vld [vmem:[#allocation7] sm:$0xff]  ;;  %v48_v3 = vld [vmem:[#allocation7 + $0x8] sm:$0xff] }
  0x29   :  { %1072 = vmatprep.subr.bf16.mxu1 %v1268_v0  ;;  %997 = vmatprep.mubr.msk.f32.mxu1 %vm1269_vm1, %v1270_v1  ;;  %v49_v4 = vld [vmem:[#allocation7 + $0x10] sm:$0xff]  ;;  %v1326_v5 = vpack.c.bf16 %v48_v3, %v47_v2  ;;  %v50_v6 = vld [vmem:[#allocation7 + $0x18] sm:$0xff]  ;;  %vm54_vm2 = vcmask 261120   ;;  %s1271_s1 = smov 64   ;;  %s1272_s8 = smov 96  }
  0x2a   :  { %v1329_v7 = vpack.c.bf16 %v50_v6, %v49_v4  ;;  %v53_v9 = vld [vmem:[#allocation4] sm:$0x3]  ;;  %v164_v29 = vld [vmem:[#allocation4 + $0x2] sm:$0x3]  ;;  %v269_v47 = vld [vmem:[#allocation4 + $0x4] sm:$0x3] }
  0x2b   :  { %1068 = vmatpush3.bf16.msra.mxu0 %v1326_v5  ;;  %1074 = vmatpush3.bf16.msra.mxu1 %v1326_v5  ;;  %v374_v3 = vld [vmem:[#allocation4 + $0x6] sm:$0x3]  ;;  %s1273_s9 = smov [#allocation9]  }
  0x2c   :  { %1069 = vmatprep.subr.bf16.mxu0 %v1268_v0  ;;  %1075 = vmatprep.subr.bf16.mxu1 %v1268_v0  ;;  %s909_s10 = sshll.u32 %s1273_s9, 4  ;;  %s910_s10 = int_to_ptr.vmem [resolvable:$true] %s909_s10 }
  0x2d   :  { %s1234_s11 = scalar_lea.vmem %s910_s10, 256  ;;  %p1239_p3 = scmp.lt.s32.totalorder %s910_s10, %s910_s10 }
  0x2e   :  { %p1235_p2 = scmp.ne.s32.totalorder %s910_s10, %s1234_s11  ;;  %p1240_p4 = scmp.lt.s32.totalorder %s1234_s11, %s1234_s11 }
  0x2f   :  { %1071 = vmatpush3.bf16.msra.mxu0 %v1329_v7  ;;  %v51_v8 = vld [vmem:[#allocation2] sm:$0x3]  ;;  %1077 = vmatpush3.bf16.msra.mxu1 %v1329_v7  ;;  %v52_v14 = vld [vmem:[#allocation3] sm:$0x3] }
  0x30   :  { %1078 = vmatprep.subr.bf16.mxu0 %v1268_v0  ;;  %1084 = vmatprep.subr.bf16.mxu1 %v1268_v0  ;;  %p1241_p5 = por %p1240_p4, %p1239_p3 }
  0x32   :  { %987 = vmatmul.mubr.msk.f32.vlgmr.msra.gmra.mrb[0].mxu0 %vm54_vm2, %v51_v8  ;;  %p1242_p6 = pnand %p1241_p5, %p1235_p2 }
  0x33   :  { %1080 = vmatpush3.bf16.msra.mxu0 %v1326_v5  ;;  %1008 = vmatprep.mubr.msk.f32.mxu0 %vm1269_vm1, %v1270_v1 }
  0x34   :  { %1081 = vmatprep.subr.bf16.mxu0 %v1268_v0 }
  0x37   :  { %1083 = vmatpush3.bf16.msra.mxu0 %v1329_v7 }
  0x38   :  { %1090 = vmatprep.subr.bf16.mxu0 %v1268_v0 }
 0x105   :  { %v124_v10 = vpop.f32.mrb[0].mxu0 }
 0x106   :  { %v128_v11 = vadd.f32 %v124_v10, %v53_v9  ;;  %v988_v12 = vpop.f32.mrb[1].mxu0 }
 0x108   :  { %1126 = vtanh.f32 %v128_v11  ;;  %v923_v15 = vmul.f32 -1.442695, %v128_v11 }
 0x10a   :  { %1128 = vpow2.f32 %v923_v15 }
 0x112   :  { %v1127_v13 = vpop.eup %1126 }
 0x113   :  { %142 = vrot.lane.b32.xlu0 %v1127_v13, %s1271_s1 }
 0x114   :  { %v1129_v16 = vpop.eup %1128 }
 0x115   :  { %v132_v17 = vadd.f32 1.0, %v1129_v16 }
 0x117   :  { %137 = vrot.lane.b32.xlu0 %v52_v14, %s1263_s19  ;;  %1130 = vrcp.f32 %v132_v17 }
 0x121   :  { %v1131_v18 = vpop.eup %1130 }
 0x185   :  { %v143_v19 = vpop.permute.xlu0 %142 }
 0x186   :  { %v145_v20 = vmul.f32 %v1131_v18, %v143_v19 }
 0x188   :  { %147 = vrot.lane.b32.xlu1 %v145_v20, %s1263_s19 }
 0x189   :  { %v138_v21 = vpop.permute.xlu0 %137 }
 0x18a   :  { %v140_v22 = vmul.f32 %v1131_v18, %v138_v21 }
 0x1fa   :  { %v148_v23 = vpop.permute.xlu1 %147 }
 0x1fb   :  { %v150_v24 = vadd.f32 %v148_v23, %v140_v22  ;;  %v479_v23 = vld [vmem:[#allocation4 + $0x8] sm:$0x3] }
 0x1fd   :  { %1132 = vtanh.f32 %v150_v24 }
 0x207   :  { %v1133_v25 = vpop.eup %1132 }
 0x208   :  { %153 = vrot.lane.b32.xlu1 %v1133_v25, %s1271_s1 }
 0x27a   :  { %v154_v26 = vpop.permute.xlu1 %153 }
 0x27b   :  { %v156_v27 = vmul.f32 %v1131_v18, %v154_v26 }
 0x27d   :  { %158 = vrot.lane.b32.xlu0 %v156_v27, %s1263_s19 }
 0x2ef   :  { %v159_v28 = vpop.permute.xlu0 %158 }
 0x2f0   :  { %162 = vst.msk [vmem:[#allocation9] sm:$0x3] %vm44_vm0, %v159_v28  ;;  %998 = vmatmul.mubr.msk.f32.vlgmr.msra.gmra.mrb[0].mxu1 %vm54_vm2, %v159_v28 }
 0x2f1   :  { %1086 = vmatpush3.bf16.msra.mxu1 %v1326_v5  ;;  %1019 = vmatprep.mubr.msk.f32.mxu1 %vm1269_vm1, %v1270_v1 }
 0x2f2   :  { %1087 = vmatprep.subr.bf16.mxu1 %v1268_v0 }
 0x2f5   :  { %1089 = vmatpush3.bf16.msra.mxu1 %v1329_v7 }
 0x2f6   :  { %1096 = vmatprep.subr.bf16.mxu1 %v1268_v0 }
 0x3c3   :  { %v233_v30 = vpop.f32.mrb[0].mxu1 }
 0x3c4   :  { %v237_v31 = vadd.f32 %v233_v30, %v164_v29  ;;  %v999_v32 = vpop.f32.mrb[1].mxu1 }
 0x3c6   :  { %1134 = vtanh.f32 %v237_v31  ;;  %v925_v34 = vmul.f32 -1.442695, %v237_v31 }
 0x3c8   :  { %1136 = vpow2.f32 %v925_v34 }
 0x3d0   :  { %v1135_v33 = vpop.eup %1134 }
 0x3d1   :  { %247 = vrot.lane.b32.xlu1 %v1135_v33, %s1271_s1 }
 0x3d2   :  { %v1137_v35 = vpop.eup %1136 }
 0x3d3   :  { %v241_v36 = vadd.f32 1.0, %v1137_v35 }
 0x3d5   :  { %1138 = vrcp.f32 %v241_v36 }
 0x3df   :  { %v1139_v37 = vpop.eup %1138 }
 0x3e0   :  { %v245_v40 = vmul.f32 %v1139_v37, %v150_v24 }
 0x443   :  { %v248_v38 = vpop.permute.xlu1 %247 }
 0x444   :  { %v250_v39 = vmul.f32 %v1139_v37, %v248_v38 }
 0x446   :  { %252 = vrot.lane.b32.xlu0 %v250_v39, %s1263_s19 }
 0x4b8   :  { %v253_v41 = vpop.permute.xlu0 %252 }
 0x4b9   :  { %v255_v42 = vadd.f32 %v253_v41, %v245_v40  ;;  %v584_v41 = vld [vmem:[#allocation4 + $0xa] sm:$0x3] }
 0x4bb   :  { %1140 = vtanh.f32 %v255_v42 }
 0x4c5   :  { %v1141_v43 = vpop.eup %1140 }
 0x4c6   :  { %258 = vrot.lane.b32.xlu1 %v1141_v43, %s1271_s1 }
 0x538   :  { %v259_v44 = vpop.permute.xlu1 %258 }
 0x539   :  { %v261_v45 = vmul.f32 %v1139_v37, %v259_v44 }
 0x53b   :  { %263 = vrot.lane.b32.xlu0 %v261_v45, %s1263_s19 }
 0x5ad   :  { %v264_v46 = vpop.permute.xlu0 %263 }
 0x5ae   :  { %267 = vst.msk [vmem:[#allocation9 + $0x2] sm:$0x3] %vm44_vm0, %v264_v46  ;;  %1009 = vmatmul.mubr.msk.f32.vlgmr.msra.gmra.mrb[2].mxu0 %vm54_vm2, %v264_v46 }
 0x5af   :  { %1092 = vmatpush3.bf16.msra.mxu0 %v1326_v5  ;;  %1030 = vmatprep.mubr.msk.f32.mxu0 %vm1269_vm1, %v1270_v1 }
 0x5b0   :  { %1093 = vmatprep.subr.bf16.mxu0 %v1268_v0 }
 0x5b3   :  { %1095 = vmatpush3.bf16.msra.mxu0 %v1329_v7 }
 0x5b4   :  { %1102 = vmatprep.subr.bf16.mxu0 %v1268_v0 }
 0x681   :  { %v338_v48 = vpop.f32.mrb[2].mxu0 }
 0x682   :  { %v342_v49 = vadd.f32 %v338_v48, %v269_v47  ;;  %v1010_v50 = vpop.f32.mrb[3].mxu0 }
 0x684   :  { %1142 = vtanh.f32 %v342_v49  ;;  %v927_v52 = vmul.f32 -1.442695, %v342_v49 }
 0x686   :  { %1144 = vpow2.f32 %v927_v52 }
 0x68e   :  { %v1143_v51 = vpop.eup %1142 }
 0x68f   :  { %352 = vrot.lane.b32.xlu1 %v1143_v51, %s1271_s1 }
 0x690   :  { %v1145_v53 = vpop.eup %1144 }
 0x691   :  { %v346_v54 = vadd.f32 1.0, %v1145_v53 }
 0x693   :  { %1146 = vrcp.f32 %v346_v54 }
 0x69d   :  { %v1147_v55 = vpop.eup %1146 }
 0x69e   :  { %v350_v58 = vmul.f32 %v1147_v55, %v255_v42 }
 0x701   :  { %v353_v56 = vpop.permute.xlu1 %352 }
 0x702   :  { %v355_v57 = vmul.f32 %v1147_v55, %v353_v56 }
 0x704   :  { %357 = vrot.lane.b32.xlu0 %v355_v57, %s1263_s19 }
 0x776   :  { %v358_v59 = vpop.permute.xlu0 %357 }
 0x777   :  { %v360_v60 = vadd.f32 %v358_v59, %v350_v58 }
 0x779   :  { %1148 = vtanh.f32 %v360_v60 }
 0x783   :  { %v1149_v61 = vpop.eup %1148 }
 0x784   :  { %363 = vrot.lane.b32.xlu1 %v1149_v61, %s1271_s1 }
 0x7f6   :  { %v364_v62 = vpop.permute.xlu1 %363 }
 0x7f7   :  { %v366_v63 = vmul.f32 %v1147_v55, %v364_v62  ;;  %v689_v55 = vld [vmem:[#allocation4 + $0xc] sm:$0x3] }
 0x7f9   :  { %368 = vrot.lane.b32.xlu0 %v366_v63, %s1263_s19 }
 0x86b   :  { %v369_v2 = vpop.permute.xlu0 %368 }
 0x86c   :  { %372 = vst.msk [vmem:[#allocation9 + $0x4] sm:$0x3] %vm44_vm0, %v369_v2  ;;  %1020 = vmatmul.mubr.msk.f32.vlgmr.msra.gmra.mrb[2].mxu1 %vm54_vm2, %v369_v2 }
 0x86d   :  { %1098 = vmatpush3.bf16.msra.mxu1 %v1326_v5  ;;  %1041 = vmatprep.mubr.msk.f32.mxu1 %vm1269_vm1, %v1270_v1 }
 0x86e   :  { %1099 = vmatprep.subr.bf16.mxu1 %v1268_v0 }
 0x871   :  { %1101 = vmatpush3.bf16.msra.mxu1 %v1329_v7 }
 0x872   :  { %1108 = vmatprep.subr.bf16.mxu1 %v1268_v0 }
 0x93f   :  { %v443_v4 = vpop.f32.mrb[2].mxu1 }
 0x940   :  { %v447_v6 = vadd.f32 %v443_v4, %v374_v3  ;;  %v1021_v8 = vpop.f32.mrb[3].mxu1 }
 0x942   :  { %1150 = vtanh.f32 %v447_v6  ;;  %v929_v10 = vmul.f32 -1.442695, %v447_v6 }
 0x944   :  { %1152 = vpow2.f32 %v929_v10 }
 0x94c   :  { %v1151_v9 = vpop.eup %1150 }
 0x94d   :  { %457 = vrot.lane.b32.xlu1 %v1151_v9, %s1271_s1 }
 0x94e   :  { %v1153_v11 = vpop.eup %1152 }
 0x94f   :  { %v451_v12 = vadd.f32 1.0, %v1153_v11 }
 0x951   :  { %1154 = vrcp.f32 %v451_v12 }
 0x95b   :  { %v1155_v13 = vpop.eup %1154 }
 0x95c   :  { %v455_v16 = vmul.f32 %v1155_v13, %v360_v60 }
 0x9bf   :  { %v458_v14 = vpop.permute.xlu1 %457 }
 0x9c0   :  { %v460_v15 = vmul.f32 %v1155_v13, %v458_v14 }
 0x9c2   :  { %462 = vrot.lane.b32.xlu0 %v460_v15, %s1263_s19 }
 0xa34   :  { %v463_v17 = vpop.permute.xlu0 %462 }
 0xa35   :  { %v465_v18 = vadd.f32 %v463_v17, %v455_v16 }
 0xa37   :  { %1156 = vtanh.f32 %v465_v18 }
 0xa41   :  { %v1157_v19 = vpop.eup %1156 }
 0xa42   :  { %468 = vrot.lane.b32.xlu1 %v1157_v19, %s1271_s1 }
 0xab4   :  { %v469_v20 = vpop.permute.xlu1 %468 }
 0xab5   :  { %v471_v21 = vmul.f32 %v1155_v13, %v469_v20  ;;  %v794_v13 = vld [vmem:[#allocation4 + $0xe] sm:$0x3] }
 0xab7   :  { %473 = vrot.lane.b32.xlu0 %v471_v21, %s1263_s19 }
 0xb29   :  { %v474_v22 = vpop.permute.xlu0 %473 }
 0xb2a   :  { %477 = vst.msk [vmem:[#allocation9 + $0x6] sm:$0x3] %vm44_vm0, %v474_v22  ;;  %1031 = vmatmul.mubr.msk.f32.vlgmr.msra.gmra.mrb[4].mxu0 %vm54_vm2, %v474_v22 }
 0xb2b   :  { %1104 = vmatpush3.bf16.msra.mxu0 %v1326_v5  ;;  %1052 = vmatprep.mubr.msk.f32.mxu0 %vm1269_vm1, %v1270_v1 }
 0xb2c   :  { %1105 = vmatprep.subr.bf16.mxu0 %v1268_v0 }
 0xb2f   :  { %1107 = vmatpush3.bf16.msra.mxu0 %v1329_v7 }
 0xbfd   :  { %v548_v24 = vpop.f32.mrb[4].mxu0 }
 0xbfe   :  { %v552_v25 = vadd.f32 %v548_v24, %v479_v23  ;;  %v1032_v26 = vpop.f32.mrb[5].mxu0 }
 0xc00   :  { %1158 = vtanh.f32 %v552_v25  ;;  %v931_v28 = vmul.f32 -1.442695, %v552_v25 }
 0xc02   :  { %1160 = vpow2.f32 %v931_v28 }
 0xc0a   :  { %v1159_v27 = vpop.eup %1158 }
 0xc0b   :  { %562 = vrot.lane.b32.xlu1 %v1159_v27, %s1271_s1 }
 0xc0c   :  { %v1161_v29 = vpop.eup %1160 }
 0xc0d   :  { %v556_v30 = vadd.f32 1.0, %v1161_v29 }
 0xc0f   :  { %1162 = vrcp.f32 %v556_v30 }
 0xc19   :  { %v1163_v31 = vpop.eup %1162 }
 0xc1a   :  { %v560_v34 = vmul.f32 %v1163_v31, %v465_v18 }
 0xc7d   :  { %v563_v32 = vpop.permute.xlu1 %562 }
 0xc7e   :  { %v565_v33 = vmul.f32 %v1163_v31, %v563_v32 }
 0xc80   :  { %567 = vrot.lane.b32.xlu0 %v565_v33, %s1263_s19 }
 0xcf2   :  { %v568_v35 = vpop.permute.xlu0 %567 }
 0xcf3   :  { %v570_v36 = vadd.f32 %v568_v35, %v560_v34 }
 0xcf5   :  { %1164 = vtanh.f32 %v570_v36 }
 0xcff   :  { %v1165_v37 = vpop.eup %1164 }
 0xd00   :  { %573 = vrot.lane.b32.xlu1 %v1165_v37, %s1271_s1 }
 0xd72   :  { %v574_v38 = vpop.permute.xlu1 %573 }
 0xd73   :  { %v576_v39 = vmul.f32 %v1163_v31, %v574_v38 }
 0xd75   :  { %578 = vrot.lane.b32.xlu0 %v576_v39, %s1263_s19 }
 0xde7   :  { %v579_v40 = vpop.permute.xlu0 %578 }
 0xde8   :  { %582 = vst.msk [vmem:[#allocation9 + $0x8] sm:$0x3] %vm44_vm0, %v579_v40  ;;  %1042 = vmatmul.mubr.msk.f32.vlgmr.msra.gmra.mrb[4].mxu1 %vm54_vm2, %v579_v40 }
 0xde9   :  { %1110 = vmatpush3.bf16.msra.mxu1 %v1326_v5  ;;  %1063 = vmatprep.mubr.msk.f32.mxu1 %vm1269_vm1, %v1270_v1 }
 0xdea   :  { %1111 = vmatprep.subr.bf16.mxu1 %v1268_v0 }
 0xded   :  { %1113 = vmatpush3.bf16.msra.mxu1 %v1329_v7 }
 0xebb   :  { %v653_v42 = vpop.f32.mrb[4].mxu1 }
 0xebc   :  { %v657_v43 = vadd.f32 %v653_v42, %v584_v41  ;;  %v1043_v44 = vpop.f32.mrb[5].mxu1 }
 0xebe   :  { %1166 = vtanh.f32 %v657_v43  ;;  %v933_v46 = vmul.f32 -1.442695, %v657_v43 }
 0xec0   :  { %1168 = vpow2.f32 %v933_v46 }
 0xec8   :  { %v1167_v45 = vpop.eup %1166 }
 0xec9   :  { %667 = vrot.lane.b32.xlu1 %v1167_v45, %s1271_s1 }
 0xeca   :  { %v1169_v47 = vpop.eup %1168 }
 0xecb   :  { %v661_v48 = vadd.f32 1.0, %v1169_v47 }
 0xecd   :  { %1170 = vrcp.f32 %v661_v48 }
 0xed7   :  { %v1171_v5 = vpop.eup %1170 }
 0xed8   :  { %v665_v0 = vmul.f32 %v1171_v5, %v570_v36 }
 0xf3b   :  { %v668_v49 = vpop.permute.xlu1 %667 }
 0xf3c   :  { %v670_v1 = vmul.f32 %v1171_v5, %v668_v49 }
 0xf3e   :  { %672 = vrot.lane.b32.xlu0 %v670_v1, %s1263_s19 }
 0xfb0   :  { %v673_v7 = vpop.permute.xlu0 %672 }
 0xfb1   :  { %v675_v50 = vadd.f32 %v673_v7, %v665_v0 }
 0xfb3   :  { %1172 = vtanh.f32 %v675_v50 }
 0xfbd   :  { %v1173_v51 = vpop.eup %1172 }
 0xfbe   :  { %678 = vrot.lane.b32.xlu1 %v1173_v51, %s1271_s1 }
0x1030   :  { %v679_v52 = vpop.permute.xlu1 %678 }
0x1031   :  { %v681_v53 = vmul.f32 %v1171_v5, %v679_v52 }
0x1033   :  { %683 = vrot.lane.b32.xlu0 %v681_v53, %s1263_s19 }
0x10a5   :  { %v684_v54 = vpop.permute.xlu0 %683 }
0x10a6   :  { %687 = vst.msk [vmem:[#allocation9 + $0xa] sm:$0x3] %vm44_vm0, %v684_v54  ;;  %1053 = vmatmul.mubr.msk.f32.vlgmr.msra.gmra.mrb[6].mxu0 %vm54_vm2, %v684_v54 }
0x1179   :  { %v758_v56 = vpop.f32.mrb[6].mxu0 }
0x117a   :  { %v762_v57 = vadd.f32 %v758_v56, %v689_v55  ;;  %v1054_v58 = vpop.f32.mrb[7].mxu0 }
0x117c   :  { %1174 = vtanh.f32 %v762_v57  ;;  %v935_v60 = vmul.f32 -1.442695, %v762_v57 }
0x117e   :  { %1176 = vpow2.f32 %v935_v60 }
0x1186   :  { %v1175_v59 = vpop.eup %1174 }
0x1187   :  { %772 = vrot.lane.b32.xlu1 %v1175_v59, %s1271_s1 }
0x1188   :  { %v1177_v61 = vpop.eup %1176 }
0x1189   :  { %v766_v62 = vadd.f32 1.0, %v1177_v61 }
0x118b   :  { %1178 = vrcp.f32 %v766_v62 }
0x1195   :  { %v1179_v63 = vpop.eup %1178 }
0x1196   :  { %v770_v4 = vmul.f32 %v1179_v63, %v675_v50 }
0x11f9   :  { %v773_v2 = vpop.permute.xlu1 %772 }
0x11fa   :  { %v775_v3 = vmul.f32 %v1179_v63, %v773_v2 }
0x11fc   :  { %777 = vrot.lane.b32.xlu0 %v775_v3, %s1263_s19 }
0x126e   :  { %v778_v6 = vpop.permute.xlu0 %777 }
0x126f   :  { %v780_v8 = vadd.f32 %v778_v6, %v770_v4 }
0x1271   :  { %1180 = vtanh.f32 %v780_v8 }
0x127b   :  { %v1181_v9 = vpop.eup %1180 }
0x127c   :  { %783 = vrot.lane.b32.xlu1 %v1181_v9, %s1271_s1 }
0x12ee   :  { %v784_v10 = vpop.permute.xlu1 %783 }
0x12ef   :  { %v786_v11 = vmul.f32 %v1179_v63, %v784_v10 }
0x12f1   :  { %788 = vrot.lane.b32.xlu0 %v786_v11, %s1263_s19 }
0x1363   :  { %v789_v12 = vpop.permute.xlu0 %788 }
0x1364   :  { %792 = vst.msk [vmem:[#allocation9 + $0xc] sm:$0x3] %vm44_vm0, %v789_v12  ;;  %1064 = vmatmul.mubr.msk.f32.vlgmr.msra.gmra.mrb[6].mxu1 %vm54_vm2, %v789_v12 }
0x1437   :  { %v863_v14 = vpop.f32.mrb[6].mxu1 }
0x1438   :  { %v867_v15 = vadd.f32 %v863_v14, %v794_v13  ;;  %v1065_v16 = vpop.f32.mrb[7].mxu1 }
0x143a   :  { %1182 = vtanh.f32 %v867_v15  ;;  %v937_v18 = vmul.f32 -1.442695, %v867_v15 }
0x143c   :  { %1184 = vpow2.f32 %v937_v18 }
0x1444   :  { %v1183_v17 = vpop.eup %1182 }
0x1445   :  { %877 = vrot.lane.b32.xlu1 %v1183_v17, %s1271_s1 }
0x1446   :  { %v1185_v19 = vpop.eup %1184 }
0x1447   :  { %v871_v20 = vadd.f32 1.0, %v1185_v19 }
0x1449   :  { %1186 = vrcp.f32 %v871_v20 }
0x1453   :  { %v1187_v21 = vpop.eup %1186 }
0x1454   :  { %v875_v24 = vmul.f32 %v1187_v21, %v780_v8 }
0x14b7   :  { %v878_v22 = vpop.permute.xlu1 %877 }
0x14b8   :  { %v880_v23 = vmul.f32 %v1187_v21, %v878_v22 }
0x14ba   :  { %882 = vrot.lane.b32.xlu0 %v880_v23, %s1263_s19 }
0x152c   :  { %v883_v25 = vpop.permute.xlu0 %882 }
0x152d   :  { %v885_v26 = vadd.f32 %v883_v25, %v875_v24 }
0x152f   :  { %1188 = vtanh.f32 %v885_v26 }
0x1539   :  { %v1189_v27 = vpop.eup %1188 }
0x153a   :  { %888 = vrot.lane.b32.xlu1 %v1189_v27, %s1271_s1 }
0x153e   :  { %900 = vrot.lane.b32.xlu1 %v885_v26, %s1272_s8 }
0x15ac   :  { %v889_v28 = vpop.permute.xlu1 %888 }
0x15ad   :  { %v891_v29 = vmul.f32 %v1187_v21, %v889_v28 }
0x15af   :  { %893 = vrot.lane.b32.xlu0 %v891_v29, %s1263_s19 }
0x15b0   :  { %v901_v30 = vpop.permute.xlu1 %900 }
0x15b1   :  { %903 = vst.msk [vmem:[#allocation3] sm:$0x3] %vm44_vm0, %v901_v30 }
0x1621   :  { %v894_v31 = vpop.permute.xlu0 %893 }
0x1622   :  { %897 = vst.msk [vmem:[#allocation9 + $0xe] sm:$0x3] %vm44_vm0, %v894_v31  ;;  %898 = vst.msk [vmem:[#allocation2] sm:$0x3] %vm44_vm0, %v894_v31 }
0x1623   :  { %1245 = shalt.err (!%p1242_p6)
}
0x1624   :  { %s1246_s14 = scalar_lea.hbm %s1440_s2, 256 }
0x1625   :  { %p1247_p7 = scmp.ne.s32.totalorder %s1440_s2, %s1246_s14  ;;  %p1250_p8 = scmp.lt.u32.totalorder %s1246_s14, %s1440_s2 }
0x1627   :  { %p1252_p9 = pnand %p1250_p8, %p1247_p7 }
0x1629   :  { %1255 = shalt.err (!%p1252_p9)
}
0x162a   :  { %915 = dma.vmem_to_hbm [thread:$0]  %s910_s10, 256, %s1440_s2, [#allocation6], %s1263_s19, %s1263_s19, %s1264_s20  }
0x162b   :  { %1260 = dma.done.wait [#allocation6], 256  }
0x162c   :  { %1261 = vsyncadd [#allocation6], 4294967040 }
0x162d   :  { %919 = vsyncpa [#allocation5], 1 }
0x162e   :  { %920 = vsyncpa [#allocation8], 1 }
0x162f   :  { %921 = vsyncpa [#allocation6], 1 }

</bundles_post_ra>
